<compile_context>
chip_gen: v7x
topology: tpu7x:2x2x1
jax: 0.10.0
libtpu: 0.0.40
codegen_flags: <defaults>
</compile_context>

<pallas_src>
import jax
import jax.numpy as jnp
from jax.experimental import pallas as pl
from jax.experimental.pallas import tpu as pltpu

IN_DIM = 1
HIDDEN = 500
OUT_DIM = 2

# Lane/sublane-friendly padded dims used inside the kernel.
HIDDEN_P = 512   # 500 -> 512 = 4 x 128 lanes (clean MXU K/N tiles)
OUT_P = 128      # 2   -> 128 (unmasked, lane-dense output stores)


def _round_up(x, m):
    return ((x + m - 1) // m) * m


def _mlp_kernel(x_ref, w1_ref, b1_ref, w2_ref, b2_ref, w3_ref, b3_ref, o_ref):
    # Layer 1: K=1 matmul is degenerate on the MXU -> do it on the VPU as a
    # broadcast outer product: (tb, 1) * (1, 512) + (1, 512), then ReLU.
    h1 = jnp.maximum(x_ref[...] * w1_ref[...] + b1_ref[...], 0.0)

    # Layer 2: (tb, 512) @ (512, 512) on the MXU, f32 accumulation, ReLU.
    h2 = jnp.dot(h1, w2_ref[...], preferred_element_type=jnp.float32)
    h2 = jnp.maximum(h2 + b2_ref[...], 0.0)

    # Layer 3: (tb, 512) @ (512, 128) on the MXU (columns >= 2 are zero padding).
    out = jnp.dot(h2, w3_ref[...], preferred_element_type=jnp.float32)
    o_ref[...] = (out + b3_ref[...]).astype(o_ref.dtype)


def feature_discriminator(score, params, *, tb=512):
    """score: (B, 1) float32. Returns (B, 2) float32.

    params: (w1 (1,500), b1 (1,500), w2 (500,500), b2 (1,500),
             w3 (500,2), b3 (1,2)) -- weights stored (in_features, out_features).
    """
    w1, b1, w2, b2, w3, b3 = params
    B = score.shape[0]

    # Effective batch tile: never larger than (B rounded up to a sublane), so
    # tiny test batches don't pad to 512 rows; large batches use tb (default 512,
    # a multiple of 256 for v6e/v7x MXU passes and of 128 for v5e).
    tb_eff = min(tb, _round_up(B, 8))
    B_pad = _round_up(B, tb_eff)

    # Pad batch with zero rows (results for those rows are discarded).
    x = score.astype(jnp.float32)
    if B_pad != B:
        x = jnp.pad(x, ((0, B_pad - B), (0, 0)))

    # Zero-pad weights/biases to lane-friendly shapes. Zero padding keeps the
    # padded hidden/output columns exactly zero through bias-add + ReLU, so the
    # first OUT_DIM output columns are bit-identical to the unpadded math.
    w1p = jnp.pad(w1.astype(jnp.float32), ((0, 0), (0, HIDDEN_P - HIDDEN)))
    b1p = jnp.pad(b1.astype(jnp.float32), ((0, 0), (0, HIDDEN_P - HIDDEN)))
    w2p = jnp.pad(w2.astype(jnp.float32),
                  ((0, HIDDEN_P - HIDDEN), (0, HIDDEN_P - HIDDEN)))
    b2p = jnp.pad(b2.astype(jnp.float32), ((0, 0), (0, HIDDEN_P - HIDDEN)))
    w3p = jnp.pad(w3.astype(jnp.float32),
                  ((0, HIDDEN_P - HIDDEN), (0, OUT_P - OUT_DIM)))
    b3p = jnp.pad(b3.astype(jnp.float32), ((0, 0), (0, OUT_P - OUT_DIM)))

    grid = (B_pad // tb_eff,)
    # Weights / biases: full arrays, resident in VMEM for every grid step.
    full = lambda shape: pl.BlockSpec(shape, lambda i: (0, 0))

    cost = pl.CostEstimate(
        flops=2 * B_pad * HIDDEN_P * HIDDEN_P          # layer 2 matmul
        + 2 * B_pad * HIDDEN_P * OUT_P                 # layer 3 matmul
        + 4 * B_pad * HIDDEN_P,                        # layer 1 mul/add + ReLUs
        transcendentals=0,
        bytes_accessed=4 * (B_pad * IN_DIM + B_pad * OUT_P
                            + HIDDEN_P * HIDDEN_P + HIDDEN_P * OUT_P
                            + 3 * HIDDEN_P + OUT_P),
    )

    out_padded = pl.pallas_call(
        _mlp_kernel,
        out_shape=jax.ShapeDtypeStruct((B_pad, OUT_P), jnp.float32),
        grid_spec=pltpu.PrefetchScalarGridSpec(
            num_scalar_prefetch=0,
            grid=grid,
            in_specs=[
                pl.BlockSpec((tb_eff, IN_DIM), lambda i: (i, 0)),  # x tile
                full((IN_DIM, HIDDEN_P)),                          # w1
                full((1, HIDDEN_P)),                               # b1
                full((HIDDEN_P, HIDDEN_P)),                        # w2
                full((1, HIDDEN_P)),                               # b2
                full((HIDDEN_P, OUT_P)),                           # w3
                full((1, OUT_P)),                                  # b3
            ],
            out_specs=pl.BlockSpec((tb_eff, OUT_P), lambda i: (i, 0)),
        ),
        compiler_params=pltpu.CompilerParams(
            dimension_semantics=("parallel",),
        ),
        cost_estimate=cost,
    )(x, w1p, b1p, w2p, b2p, w3p, b3p)

    return out_padded[:B, :OUT_DIM]


def init_params(key):
    """Init matching nn.Linear default (U[-1/sqrt(fan_in), +1/sqrt(fan_in)]).

    Weights stored as (in_features, out_features); biases as (1, out_features)."""
    def linear(key, fan_in, fan_out):
        kw, kb = jax.random.split(key)
        bound = 1.0 / jnp.sqrt(jnp.float32(fan_in))
        w = jax.random.uniform(kw, (fan_in, fan_out), jnp.float32, -bound, bound)
        b = jax.random.uniform(kb, (1, fan_out), jnp.float32, -bound, bound)
        return w, b

    k1, k2, k3 = jax.random.split(key, 3)
    w1, b1 = linear(k1, IN_DIM, HIDDEN)
    w2, b2 = linear(k2, HIDDEN, HIDDEN)
    w3, b3 = linear(k3, HIDDEN, OUT_DIM)
    return (w1, b1, w2, b2, w3, b3)


def reference(score, params):
    w1, b1, w2, b2, w3, b3 = params
    h1 = jnp.maximum(score @ w1 + b1, 0.0)
    h2 = jnp.maximum(h1 @ w2 + b2, 0.0)
    return h2 @ w3 + b3


if __name__ == "__main__":
    key = jax.random.PRNGKey(0)
    k_params, k_x1, k_x2 = jax.random.split(key, 3)

    params = init_params(k_params)

    # Small, tile-aligned batch.
    score = jax.random.normal(k_x1, (8, IN_DIM), jnp.float32)
    out = jax.block_until_ready(feature_discriminator(score, params))
    ref = reference(score, params)
    assert out.shape == (8, OUT_DIM)
    assert jnp.allclose(out, ref, atol=1e-4, rtol=1e-4), "mismatch vs reference (B=8)"

    # Non-multiple batch exercises the batch-padding path.
    score2 = jax.random.normal(k_x2, (12, IN_DIM), jnp.float32)
    out2 = jax.block_until_ready(feature_discriminator(score2, params))
    ref2 = reference(score2, params)
    assert out2.shape == (12, OUT_DIM)
    assert jnp.allclose(out2, ref2, atol=1e-4, rtol=1e-4), "mismatch vs reference (B=12)"

    print("KERNEL_OK")
</pallas_src>

<mosaic_0001>
module attributes {stable_mosaic.version = 11 : i64} {
  func.func @_mlp_kernel(%arg0: i32, %arg1: memref<8x1xf32, #tpu.memory_space<vmem>>, %arg2: memref<1x512xf32, #tpu.memory_space<vmem>>, %arg3: memref<1x512xf32, #tpu.memory_space<vmem>>, %arg4: memref<512x512xf32, #tpu.memory_space<vmem>>, %arg5: memref<1x512xf32, #tpu.memory_space<vmem>>, %arg6: memref<512x128xf32, #tpu.memory_space<vmem>>, %arg7: memref<1x128xf32, #tpu.memory_space<vmem>>, %arg8: memref<8x128xf32, #tpu.memory_space<vmem>>) attributes {dimension_semantics = [#tpu.dimension_semantics<parallel>], iteration_bounds = array<i64: 1>, scalar_prefetch = 0 : i64, scratch_operands = 0 : i64, tpu.core_type = #tpu.core_type<tc>, window_params = [{transform_indices = @transform_0, window_bounds = array<i64: 8, 1>}, {pipeline_mode = #tpu.pipeline_mode<synchronous>, transform_indices = @transform_1, window_bounds = array<i64: 1, 512>}, {pipeline_mode = #tpu.pipeline_mode<synchronous>, transform_indices = @transform_2, window_bounds = array<i64: 1, 512>}, {pipeline_mode = #tpu.pipeline_mode<synchronous>, transform_indices = @transform_3, window_bounds = array<i64: 512, 512>}, {pipeline_mode = #tpu.pipeline_mode<synchronous>, transform_indices = @transform_4, window_bounds = array<i64: 1, 512>}, {pipeline_mode = #tpu.pipeline_mode<synchronous>, transform_indices = @transform_5, window_bounds = array<i64: 512, 128>}, {pipeline_mode = #tpu.pipeline_mode<synchronous>, transform_indices = @transform_6, window_bounds = array<i64: 1, 128>}, {transform_indices = @transform_7, window_bounds = array<i64: 8, 128>}]} {
    %c0 = arith.constant 0 : index
    %c0_0 = arith.constant 0 : index
    %0 = vector.load %arg1[%c0, %c0_0] : memref<8x1xf32, #tpu.memory_space<vmem>>, vector<8x1xf32>
    %c0_1 = arith.constant 0 : index
    %c0_2 = arith.constant 0 : index
    %1 = vector.load %arg2[%c0_1, %c0_2] : memref<1x512xf32, #tpu.memory_space<vmem>>, vector<1x512xf32>
    %2 = vector.broadcast %0 : vector<8x1xf32> to vector<8x512xf32>
    %3 = vector.broadcast %1 : vector<1x512xf32> to vector<8x512xf32>
    %4 = arith.mulf %2, %3 : vector<8x512xf32>
    %c0_3 = arith.constant 0 : index
    %c0_4 = arith.constant 0 : index
    %5 = vector.load %arg3[%c0_3, %c0_4] : memref<1x512xf32, #tpu.memory_space<vmem>>, vector<1x512xf32>
    %6 = vector.broadcast %5 : vector<1x512xf32> to vector<8x512xf32>
    %7 = arith.addf %4, %6 : vector<8x512xf32>
    %cst = arith.constant 0.000000e+00 : f32
    %8 = vector.broadcast %cst : f32 to vector<8x512xf32>
    %9 = arith.maximumf %7, %8 : vector<8x512xf32>
    %c0_5 = arith.constant 0 : index
    %c0_6 = arith.constant 0 : index
    %10 = vector.load %arg4[%c0_5, %c0_6] : memref<512x512xf32, #tpu.memory_space<vmem>>, vector<512x512xf32>
    %cst_7 = arith.constant dense<0.000000e+00> : vector<8x512xf32>
    %11 = tpu.matmul %9, %10, %cst_7 {dimension_numbers = #tpu.dot_dimension_numbers<[1], [0], [0], [1], [0, 0, 1, 1], [], []>} : vector<8x512xf32>, vector<512x512xf32>, vector<8x512xf32> -> vector<8x512xf32>
    %c0_8 = arith.constant 0 : index
    %c0_9 = arith.constant 0 : index
    %12 = vector.load %arg5[%c0_8, %c0_9] : memref<1x512xf32, #tpu.memory_space<vmem>>, vector<1x512xf32>
    %13 = vector.broadcast %12 : vector<1x512xf32> to vector<8x512xf32>
    %14 = arith.addf %11, %13 : vector<8x512xf32>
    %cst_10 = arith.constant 0.000000e+00 : f32
    %15 = vector.broadcast %cst_10 : f32 to vector<8x512xf32>
    %16 = arith.maximumf %14, %15 : vector<8x512xf32>
    %c0_11 = arith.constant 0 : index
    %c0_12 = arith.constant 0 : index
    %17 = vector.load %arg6[%c0_11, %c0_12] : memref<512x128xf32, #tpu.memory_space<vmem>>, vector<512x128xf32>
    %cst_13 = arith.constant dense<0.000000e+00> : vector<8x128xf32>
    %18 = tpu.matmul %16, %17, %cst_13 {dimension_numbers = #tpu.dot_dimension_numbers<[1], [0], [0], [1], [0, 0, 1, 1], [], []>} : vector<8x512xf32>, vector<512x128xf32>, vector<8x128xf32> -> vector<8x128xf32>
    %c0_14 = arith.constant 0 : index
    %c0_15 = arith.constant 0 : index
    %19 = vector.load %arg7[%c0_14, %c0_15] : memref<1x128xf32, #tpu.memory_space<vmem>>, vector<1x128xf32>
    %20 = vector.broadcast %19 : vector<1x128xf32> to vector<8x128xf32>
    %21 = arith.addf %18, %20 : vector<8x128xf32>
    %c0_16 = arith.constant 0 : index
    %c0_17 = arith.constant 0 : index
    %22 = vector.load %arg8[%c0_16, %c0_17] : memref<8x128xf32, #tpu.memory_space<vmem>>, vector<8x128xf32>
    tpu.vector_store %arg8[%c0_16, %c0_17], %21 {strides = array<i32>} : memref<8x128xf32, #tpu.memory_space<vmem>>, vector<8x128xf32>,
    return
  }
  func.func @transform_0(%arg0: i32) -> (i32, i32) {
    %c0_i32 = arith.constant 0 : i32
    %c0_i32_0 = arith.constant 0 : i32
    return %arg0, %c0_i32 : i32, i32
  }
  func.func @transform_1(%arg0: i32) -> (i32, i32) {
    %c0_i32 = arith.constant 0 : i32
    %c0_i32_0 = arith.constant 0 : i32
    %c0_i32_1 = arith.constant 0 : i32
    return %c0_i32, %c0_i32_0 : i32, i32
  }
  func.func @transform_2(%arg0: i32) -> (i32, i32) {
    %c0_i32 = arith.constant 0 : i32
    %c0_i32_0 = arith.constant 0 : i32
    %c0_i32_1 = arith.constant 0 : i32
    return %c0_i32, %c0_i32_0 : i32, i32
  }
  func.func @transform_3(%arg0: i32) -> (i32, i32) {
    %c0_i32 = arith.constant 0 : i32
    %c0_i32_0 = arith.constant 0 : i32
    %c0_i32_1 = arith.constant 0 : i32
    return %c0_i32, %c0_i32_0 : i32, i32
  }
  func.func @transform_4(%arg0: i32) -> (i32, i32) {
    %c0_i32 = arith.constant 0 : i32
    %c0_i32_0 = arith.constant 0 : i32
    %c0_i32_1 = arith.constant 0 : i32
    return %c0_i32, %c0_i32_0 : i32, i32
  }
  func.func @transform_5(%arg0: i32) -> (i32, i32) {
    %c0_i32 = arith.constant 0 : i32
    %c0_i32_0 = arith.constant 0 : i32
    %c0_i32_1 = arith.constant 0 : i32
    return %c0_i32, %c0_i32_0 : i32, i32
  }
  func.func @transform_6(%arg0: i32) -> (i32, i32) {
    %c0_i32 = arith.constant 0 : i32
    %c0_i32_0 = arith.constant 0 : i32
    %c0_i32_1 = arith.constant 0 : i32
    return %c0_i32, %c0_i32_0 : i32, i32
  }
  func.func @transform_7(%arg0: i32) -> (i32, i32) {
    %c0_i32 = arith.constant 0 : i32
    %c0_i32_0 = arith.constant 0 : i32
    return %arg0, %c0_i32 : i32, i32
  }
}

</mosaic_0001>

<bundles_post_ra>
// kernel: tpu_custom_call.1
= control target key start
LH: loop header
LB: loop body
LE: loop exit
PB: predicated region body
PF: predicated region fallthrough
CT: control target
= control target key end

     0   :  { %12 = vsyncpa [#allocation3], 0  ;;  %s1513_s0 = inlined_call_operand.vmem [shape: f32[8,1], index: 0, kind: input, shape index: {}]   ;;  %s1514_s1 = inlined_call_operand.vmem [shape: f32[1,512], index: 1, kind: input, shape index: {}]   ;;  %s1515_s2 = inlined_call_operand.vmem [shape: f32[1,512], index: 2, kind: input, shape index: {}]   ;;  %s1516_s3 = inlined_call_operand.hbm [shape: f32[512,512], index: 3, kind: input, shape index: {}]   ;;  %s1517_s4 = inlined_call_operand.vmem [shape: f32[1,512], index: 4, kind: input, shape index: {}]   ;;  %s1518_s5 = inlined_call_operand.hbm [shape: f32[512,128], index: 5, kind: input, shape index: {}]   ;;  %s1519_s6 = inlined_call_operand.vmem [shape: f32[1,128], index: 6, kind: input, shape index: {}]   ;;  %s1520_s7 = inlined_call_operand.hbm [shape: f32[8,128], index: 7, kind: output, shape index: {}]  }
   0x1   :  { %13 = vsyncpa [#allocation6], 0 }
   0x2   :  { %14 = vsyncpa [#allocation4], 0  ;;  %s1391_s24 = smov [#allocation2]   ;;  %s1319_s28 = scalar_lea.hbm %s1516_s3, 32768 }
   0x3   :  { %s26_s25 = sshll.u32 %s1391_s24, 4  ;;  %p1320_p0 = scmp.ne.s32.totalorder %s1516_s3, %s1319_s28  ;;  %s27_s25 = int_to_ptr.vmem [resolvable:$true] %s26_s25 }
   0x4   :  { %p1323_p1 = scmp.lt.u32.totalorder %s1319_s28, %s1516_s3 }
   0x6   :  { %p1325_p2 = pnand %p1323_p1, %p1320_p0 }
   0x8   :  { %1328 = shalt.err (!%p1325_p2)
}
   0x9   :  { %s1329_s10 = scalar_lea.vmem %s27_s25, 32768  ;;  %p1334_p4 = scmp.lt.s32.totalorder %s27_s25, %s27_s25 }
   0xa   :  { %p1330_p3 = scmp.ne.s32.totalorder %s27_s25, %s1329_s10  ;;  %p1335_p5 = scmp.lt.s32.totalorder %s1329_s10, %s1329_s10 }
   0xc   :  { %p1336_p6 = por %p1335_p5, %p1334_p4 }
   0xe   :  { %p1337_p7 = pnand %p1336_p6, %p1330_p3 }
  0x10   :  { %1340 = shalt.err (!%p1337_p7)
}
  0x11   :  { %s1392_s11 = smov 512   ;;  %s1393_s12 = smov 32  }
  0x12   :  { %32 = dma.hbm_to_vmem [thread:$0]  %s1516_s3, 32768, %s27_s25, [#allocation3], %s1392_s11, %s1392_s11, %s1393_s12  }
  0x13   :  { %s1394_s15 = smov [#allocation5]   ;;  %s1341_s19 = scalar_lea.hbm %s1518_s5, 8192 }
  0x14   :  { %s40_s16 = sshll.u32 %s1394_s15, 4  ;;  %p1342_p8 = scmp.ne.s32.totalorder %s1518_s5, %s1341_s19  ;;  %s41_s16 = int_to_ptr.vmem [resolvable:$true] %s40_s16 }
  0x15   :  { %p1345_p9 = scmp.lt.u32.totalorder %s1341_s19, %s1518_s5 }
  0x17   :  { %p1347_p10 = pnand %p1345_p9, %p1342_p8 }
  0x19   :  { %1350 = shalt.err (!%p1347_p10)
}
  0x1a   :  { %s1351_s24 = scalar_lea.vmem %s41_s16, 8192  ;;  %p1356_p12 = scmp.lt.s32.totalorder %s41_s16, %s41_s16 }
  0x1b   :  { %p1352_p11 = scmp.ne.s32.totalorder %s41_s16, %s1351_s24  ;;  %p1357_p13 = scmp.lt.s32.totalorder %s1351_s24, %s1351_s24 }
  0x1d   :  { %p1358_p0 = por %p1357_p13, %p1356_p12 }
  0x1f   :  { %p1359_p1 = pnand %p1358_p0, %p1352_p11 }
  0x21   :  { %1362 = shalt.err (!%p1359_p1)
}
  0x22   :  { %s1395_s3 = smov 128   ;;  %s1396_s25 = smov 8  }
  0x23   :  { %46 = dma.hbm_to_vmem [thread:$0]  %s1518_s5, 8192, %s41_s16, [#allocation6], %s1395_s3, %s1395_s3, %s1396_s25  }
  0x24   :  { %1385 = dma.done.wait [#allocation3], 32768  }
  0x25   :  { %1386 = vsyncadd [#allocation3], 4294934528 }
  0x26   :  { %1387 = dma.done.wait [#allocation6], 8192  }
  0x27   :  { %1388 = vsyncadd [#allocation6], 4294959104  ;;  %v1397_v0 = vmov 0   ;;  %v55_v1 = vld [vmem:[%s1513_s0] sm:$0xff]  ;;  %v118_v2 = vld [vmem:[#allocation2 + $0x8] sm:$0xff]  ;;  %s1398_s10 = smov [#allocation7]  }
  0x28   :  { %1318 = vset.pattern.permute.xlu0 %v1397_v0  ;;  %v122_v3 = vld [vmem:[#allocation2 + $0x28] sm:$0xff]  ;;  %v120_v5 = vld [vmem:[#allocation2 + $0x18] sm:$0xff]  ;;  %v117_v7 = vld [vmem:[#allocation2] sm:$0xff]  ;;  %s901_s11 = sshll.u32 %s1398_s10, 4  ;;  %s902_s11 = int_to_ptr.vmem [resolvable:$true] %s901_s11 }
  0x29   :  { %59 = vperm.xlu0 %1318, %v55_v1   ;;  %v982_v4 = vpack.c.bf16 %v122_v3, %v118_v2  ;;  %v124_v6 = vld [vmem:[#allocation2 + $0x38] sm:$0xff]  ;;  %v121_v9 = vld [vmem:[#allocation2 + $0x20] sm:$0xff]  ;;  %v119_v10 = vld [vmem:[#allocation2 + $0x10] sm:$0xff]  ;;  %s1363_s12 = scalar_lea.vmem %s902_s11, 128  ;;  %p1368_p3 = scmp.lt.s32.totalorder %s902_s11, %s902_s11 }
  0x2a   :  { %v1110_v8 = vpack.c.bf16 %v124_v6, %v120_v5  ;;  %v123_v11 = vld [vmem:[#allocation2 + $0x30] sm:$0xff]  ;;  %v984_v12 = vpack.c.bf16 %v121_v9, %v117_v7  ;;  %v126_v14 = vld [vmem:[#allocation2 + $0x48] sm:$0xff]  ;;  %v128_v16 = vld [vmem:[#allocation2 + $0x58] sm:$0xff]  ;;  %p1364_p2 = scmp.ne.s32.totalorder %s902_s11, %s1363_s12  ;;  %p1369_p4 = scmp.lt.s32.totalorder %s1363_s12, %s1363_s12 }
  0x2b   :  { %983 = vmatprep.subr.bf16.mxu0 %v982_v4  ;;  %v1112_v13 = vpack.c.bf16 %v123_v11, %v119_v10  ;;  %v130_v15 = vld [vmem:[#allocation2 + $0x68] sm:$0xff]  ;;  %v132_v18 = vld [vmem:[#allocation2 + $0x78] sm:$0xff]  ;;  %v125_v19 = vld [vmem:[#allocation2 + $0x40] sm:$0xff] }
  0x2c   :  { %1111 = vmatprep.subr.bf16.mxu1 %v1110_v8  ;;  %v986_v17 = vpack.c.bf16 %v130_v15, %v126_v14  ;;  %v129_v20 = vld [vmem:[#allocation2 + $0x60] sm:$0xff]  ;;  %985 = vmatpush1.bf16.msra.mxu0 %v984_v12  ;;  %v1114_v21 = vpack.c.bf16 %v132_v18, %v128_v16  ;;  %v127_v23 = vld [vmem:[#allocation2 + $0x50] sm:$0xff]  ;;  %v134_v25 = vld [vmem:[#allocation2 + $0x88] sm:$0xff]  ;;  %p1370_p5 = por %p1369_p4, %p1368_p3 }
  0x2d   :  { %1113 = vmatpush1.bf16.msra.mxu1 %v1112_v13  ;;  %v988_v22 = vpack.c.bf16 %v129_v20, %v125_v19  ;;  %v131_v24 = vld [vmem:[#allocation2 + $0x70] sm:$0xff]  ;;  %v138_v27 = vld [vmem:[#allocation2 + $0xa8] sm:$0xff]  ;;  %v136_v28 = vld [vmem:[#allocation2 + $0x98] sm:$0xff] }
  0x2e   :  { %987 = vmatprep.subr.bf16.mxu0 %v986_v17  ;;  %v1116_v26 = vpack.c.bf16 %v131_v24, %v127_v23  ;;  %v140_v29 = vld [vmem:[#allocation2 + $0xb8] sm:$0xff]  ;;  %1115 = vmatprep.subr.bf16.mxu1 %v1114_v21  ;;  %v990_v30 = vpack.c.bf16 %v138_v27, %v134_v25  ;;  %v133_v32 = vld [vmem:[#allocation2 + $0x80] sm:$0xff]  ;;  %v135_v34 = vld [vmem:[#allocation2 + $0x90] sm:$0xff]  ;;  %p1371_p6 = pnand %p1370_p5, %p1364_p2 }
  0x2f   :  { %v1118_v31 = vpack.c.bf16 %v140_v29, %v136_v28  ;;  %v137_v33 = vld [vmem:[#allocation2 + $0xa0] sm:$0xff]  ;;  %v139_v35 = vld [vmem:[#allocation2 + $0xb0] sm:$0xff]  ;;  %v142_v36 = vld [vmem:[#allocation2 + $0xc8] sm:$0xff] }
  0x30   :  { %v146_v37 = vld [vmem:[#allocation2 + $0xe8] sm:$0xff]  ;;  %989 = vmatpush1.bf16.msra.mxu0 %v988_v22  ;;  %v992_v38 = vpack.c.bf16 %v137_v33, %v133_v32  ;;  %v1120_v39 = vpack.c.bf16 %v139_v35, %v135_v34  ;;  %v144_v40 = vld [vmem:[#allocation2 + $0xd8] sm:$0xff]  ;;  %v141_v42 = vld [vmem:[#allocation2 + $0xc0] sm:$0xff] }
  0x31   :  { %1117 = vmatpush1.bf16.msra.mxu1 %v1116_v26  ;;  %v148_v41 = vld [vmem:[#allocation2 + $0xf8] sm:$0xff]  ;;  %991 = vmatprep.subr.bf16.mxu0 %v990_v30  ;;  %v994_v43 = vpack.c.bf16 %v146_v37, %v142_v36  ;;  %v145_v45 = vld [vmem:[#allocation2 + $0xe0] sm:$0xff]  ;;  %v143_v46 = vld [vmem:[#allocation2 + $0xd0] sm:$0xff] }
  0x32   :  { %1119 = vmatprep.subr.bf16.mxu1 %v1118_v31  ;;  %v1122_v44 = vpack.c.bf16 %v148_v41, %v144_v40  ;;  %v147_v47 = vld [vmem:[#allocation2 + $0xf0] sm:$0xff]  ;;  %v150_v48 = vld [vmem:[#allocation2 + $0x108] sm:$0xff]  ;;  %v152_v50 = vld [vmem:[#allocation2 + $0x118] sm:$0xff]  ;;  %v996_v52 = vpack.c.bf16 %v145_v45, %v141_v42 }
  0x33   :  { %v154_v49 = vld [vmem:[#allocation2 + $0x128] sm:$0xff]  ;;  %v156_v51 = vld [vmem:[#allocation2 + $0x138] sm:$0xff]  ;;  %v1124_v53 = vpack.c.bf16 %v147_v47, %v143_v46  ;;  %v149_v54 = vld [vmem:[#allocation2 + $0x100] sm:$0xff] }
  0x34   :  { %993 = vmatpush1.bf16.msra.mxu0 %v992_v38  ;;  %v153_v55 = vld [vmem:[#allocation2 + $0x120] sm:$0xff]  ;;  %v998_v56 = vpack.c.bf16 %v154_v49, %v150_v48  ;;  %v1126_v57 = vpack.c.bf16 %v156_v51, %v152_v50  ;;  %v151_v58 = vld [vmem:[#allocation2 + $0x110] sm:$0xff]  ;;  %v158_v60 = vld [vmem:[#allocation2 + $0x148] sm:$0xff] }
  0x35   :  { %1121 = vmatpush1.bf16.msra.mxu1 %v1120_v39  ;;  %995 = vmatprep.subr.bf16.mxu0 %v994_v43  ;;  %v155_v59 = vld [vmem:[#allocation2 + $0x130] sm:$0xff]  ;;  %v162_v61 = vld [vmem:[#allocation2 + $0x168] sm:$0xff]  ;;  %v160_v62 = vld [vmem:[#allocation2 + $0x158] sm:$0xff]  ;;  %v1000_v0 = vpack.c.bf16 %v153_v55, %v149_v54 }
  0x36   :  { %1123 = vmatprep.subr.bf16.mxu1 %v1122_v44  ;;  %v164_v63 = vld [vmem:[#allocation2 + $0x178] sm:$0xff]  ;;  %v1128_v1 = vpack.c.bf16 %v155_v59, %v151_v58  ;;  %v157_v2 = vld [vmem:[#allocation2 + $0x140] sm:$0xff]  ;;  %v1002_v4 = vpack.c.bf16 %v162_v61, %v158_v60  ;;  %v159_v6 = vld [vmem:[#allocation2 + $0x150] sm:$0xff] }
  0x37   :  { %v161_v3 = vld [vmem:[#allocation2 + $0x160] sm:$0xff]  ;;  %v1130_v5 = vpack.c.bf16 %v164_v63, %v160_v62  ;;  %v163_v7 = vld [vmem:[#allocation2 + $0x170] sm:$0xff]  ;;  %v166_v8 = vld [vmem:[#allocation2 + $0x188] sm:$0xff] }
  0x38   :  { %997 = vmatpush1.bf16.msra.mxu0 %v996_v52  ;;  %v170_v9 = vld [vmem:[#allocation2 + $0x1a8] sm:$0xff]  ;;  %v168_v10 = vld [vmem:[#allocation2 + $0x198] sm:$0xff]  ;;  %v1004_v12 = vpack.c.bf16 %v161_v3, %v157_v2  ;;  %v1132_v13 = vpack.c.bf16 %v163_v7, %v159_v6  ;;  %v165_v14 = vld [vmem:[#allocation2 + $0x180] sm:$0xff] }
  0x39   :  { %1125 = vmatpush1.bf16.msra.mxu1 %v1124_v53  ;;  %999 = vmatprep.subr.bf16.mxu0 %v998_v56  ;;  %v172_v11 = vld [vmem:[#allocation2 + $0x1b8] sm:$0xff]  ;;  %v169_v15 = vld [vmem:[#allocation2 + $0x1a0] sm:$0xff]  ;;  %v1006_v16 = vpack.c.bf16 %v170_v9, %v166_v8  ;;  %v167_v18 = vld [vmem:[#allocation2 + $0x190] sm:$0xff] }
  0x3a   :  { %1127 = vmatprep.subr.bf16.mxu1 %v1126_v57  ;;  %v1134_v17 = vpack.c.bf16 %v172_v11, %v168_v10  ;;  %v171_v19 = vld [vmem:[#allocation2 + $0x1b0] sm:$0xff]  ;;  %v174_v20 = vld [vmem:[#allocation2 + $0x1c8] sm:$0xff]  ;;  %v176_v22 = vld [vmem:[#allocation2 + $0x1d8] sm:$0xff]  ;;  %v1008_v24 = vpack.c.bf16 %v169_v15, %v165_v14 }
  0x3b   :  { %v178_v21 = vld [vmem:[#allocation2 + $0x1e8] sm:$0xff]  ;;  %v180_v23 = vld [vmem:[#allocation2 + $0x1f8] sm:$0xff]  ;;  %v1136_v25 = vpack.c.bf16 %v171_v19, %v167_v18  ;;  %v173_v26 = vld [vmem:[#allocation2 + $0x1c0] sm:$0xff] }
  0x3c   :  { %1001 = vmatpush1.bf16.msra.mxu0 %v1000_v0  ;;  %v177_v27 = vld [vmem:[#allocation2 + $0x1e0] sm:$0xff]  ;;  %v1010_v28 = vpack.c.bf16 %v178_v21, %v174_v20  ;;  %v1138_v29 = vpack.c.bf16 %v180_v23, %v176_v22  ;;  %v175_v30 = vld [vmem:[#allocation2 + $0x1d0] sm:$0xff]  ;;  %v182_v32 = vld [vmem:[#allocation2 + $0x208] sm:$0xff] }
  0x3d   :  { %1129 = vmatpush1.bf16.msra.mxu1 %v1128_v1  ;;  %1003 = vmatprep.subr.bf16.mxu0 %v1002_v4  ;;  %v179_v31 = vld [vmem:[#allocation2 + $0x1f0] sm:$0xff]  ;;  %v186_v33 = vld [vmem:[#allocation2 + $0x228] sm:$0xff]  ;;  %v184_v34 = vld [vmem:[#allocation2 + $0x218] sm:$0xff]  ;;  %v1012_v36 = vpack.c.bf16 %v177_v27, %v173_v26 }
  0x3e   :  { %1131 = vmatprep.subr.bf16.mxu1 %v1130_v5  ;;  %v188_v35 = vld [vmem:[#allocation2 + $0x238] sm:$0xff]  ;;  %v1140_v37 = vpack.c.bf16 %v179_v31, %v175_v30  ;;  %v181_v38 = vld [vmem:[#allocation2 + $0x200] sm:$0xff]  ;;  %v1014_v40 = vpack.c.bf16 %v186_v33, %v182_v32  ;;  %v183_v42 = vld [vmem:[#allocation2 + $0x210] sm:$0xff] }
  0x3f   :  { %v185_v39 = vld [vmem:[#allocation2 + $0x220] sm:$0xff]  ;;  %v1142_v41 = vpack.c.bf16 %v188_v35, %v184_v34  ;;  %v187_v43 = vld [vmem:[#allocation2 + $0x230] sm:$0xff]  ;;  %v190_v44 = vld [vmem:[#allocation2 + $0x248] sm:$0xff] }
  0x40   :  { %1005 = vmatpush1.bf16.msra.mxu0 %v1004_v12  ;;  %v194_v45 = vld [vmem:[#allocation2 + $0x268] sm:$0xff]  ;;  %v192_v46 = vld [vmem:[#allocation2 + $0x258] sm:$0xff]  ;;  %v1016_v48 = vpack.c.bf16 %v185_v39, %v181_v38  ;;  %v1144_v49 = vpack.c.bf16 %v187_v43, %v183_v42  ;;  %v189_v50 = vld [vmem:[#allocation2 + $0x240] sm:$0xff] }
  0x41   :  { %1133 = vmatpush1.bf16.msra.mxu1 %v1132_v13  ;;  %1007 = vmatprep.subr.bf16.mxu0 %v1006_v16  ;;  %v196_v47 = vld [vmem:[#allocation2 + $0x278] sm:$0xff]  ;;  %v193_v51 = vld [vmem:[#allocation2 + $0x260] sm:$0xff]  ;;  %v1018_v52 = vpack.c.bf16 %v194_v45, %v190_v44  ;;  %v191_v54 = vld [vmem:[#allocation2 + $0x250] sm:$0xff] }
  0x42   :  { %1135 = vmatprep.subr.bf16.mxu1 %v1134_v17  ;;  %v1146_v53 = vpack.c.bf16 %v196_v47, %v192_v46  ;;  %v195_v55 = vld [vmem:[#allocation2 + $0x270] sm:$0xff]  ;;  %v198_v56 = vld [vmem:[#allocation2 + $0x288] sm:$0xff]  ;;  %v200_v58 = vld [vmem:[#allocation2 + $0x298] sm:$0xff]  ;;  %v1020_v60 = vpack.c.bf16 %v193_v51, %v189_v50 }
  0x43   :  { %v202_v57 = vld [vmem:[#allocation2 + $0x2a8] sm:$0xff]  ;;  %v204_v59 = vld [vmem:[#allocation2 + $0x2b8] sm:$0xff]  ;;  %v1148_v61 = vpack.c.bf16 %v195_v55, %v191_v54  ;;  %v197_v62 = vld [vmem:[#allocation2 + $0x280] sm:$0xff] }
  0x44   :  { %1009 = vmatpush1.bf16.msra.mxu0 %v1008_v24  ;;  %v201_v63 = vld [vmem:[#allocation2 + $0x2a0] sm:$0xff]  ;;  %v1022_v0 = vpack.c.bf16 %v202_v57, %v198_v56  ;;  %v1150_v1 = vpack.c.bf16 %v204_v59, %v200_v58  ;;  %v199_v2 = vld [vmem:[#allocation2 + $0x290] sm:$0xff]  ;;  %v206_v4 = vld [vmem:[#allocation2 + $0x2c8] sm:$0xff] }
  0x45   :  { %1137 = vmatpush1.bf16.msra.mxu1 %v1136_v25  ;;  %1011 = vmatprep.subr.bf16.mxu0 %v1010_v28  ;;  %v203_v3 = vld [vmem:[#allocation2 + $0x2b0] sm:$0xff]  ;;  %v210_v5 = vld [vmem:[#allocation2 + $0x2e8] sm:$0xff]  ;;  %v208_v6 = vld [vmem:[#allocation2 + $0x2d8] sm:$0xff]  ;;  %v1024_v8 = vpack.c.bf16 %v201_v63, %v197_v62 }
  0x46   :  { %1139 = vmatprep.subr.bf16.mxu1 %v1138_v29  ;;  %v212_v7 = vld [vmem:[#allocation2 + $0x2f8] sm:$0xff]  ;;  %v1152_v9 = vpack.c.bf16 %v203_v3, %v199_v2  ;;  %v205_v10 = vld [vmem:[#allocation2 + $0x2c0] sm:$0xff]  ;;  %v1026_v12 = vpack.c.bf16 %v210_v5, %v206_v4  ;;  %v207_v14 = vld [vmem:[#allocation2 + $0x2d0] sm:$0xff] }
  0x47   :  { %v209_v11 = vld [vmem:[#allocation2 + $0x2e0] sm:$0xff]  ;;  %v1154_v13 = vpack.c.bf16 %v212_v7, %v208_v6  ;;  %v211_v15 = vld [vmem:[#allocation2 + $0x2f0] sm:$0xff]  ;;  %v214_v16 = vld [vmem:[#allocation2 + $0x308] sm:$0xff] }
  0x48   :  { %1013 = vmatpush1.bf16.msra.mxu0 %v1012_v36  ;;  %v218_v17 = vld [vmem:[#allocation2 + $0x328] sm:$0xff]  ;;  %v216_v18 = vld [vmem:[#allocation2 + $0x318] sm:$0xff]  ;;  %v1028_v20 = vpack.c.bf16 %v209_v11, %v205_v10  ;;  %v1156_v21 = vpack.c.bf16 %v211_v15, %v207_v14  ;;  %v213_v22 = vld [vmem:[#allocation2 + $0x300] sm:$0xff] }
  0x49   :  { %1141 = vmatpush1.bf16.msra.mxu1 %v1140_v37  ;;  %1015 = vmatprep.subr.bf16.mxu0 %v1014_v40  ;;  %v220_v19 = vld [vmem:[#allocation2 + $0x338] sm:$0xff]  ;;  %v217_v23 = vld [vmem:[#allocation2 + $0x320] sm:$0xff]  ;;  %v1030_v24 = vpack.c.bf16 %v218_v17, %v214_v16  ;;  %v215_v26 = vld [vmem:[#allocation2 + $0x310] sm:$0xff] }
  0x4a   :  { %1143 = vmatprep.subr.bf16.mxu1 %v1142_v41  ;;  %v1158_v25 = vpack.c.bf16 %v220_v19, %v216_v18  ;;  %v219_v27 = vld [vmem:[#allocation2 + $0x330] sm:$0xff]  ;;  %v222_v28 = vld [vmem:[#allocation2 + $0x348] sm:$0xff]  ;;  %v224_v30 = vld [vmem:[#allocation2 + $0x358] sm:$0xff]  ;;  %v1032_v32 = vpack.c.bf16 %v217_v23, %v213_v22 }
  0x4b   :  { %v226_v29 = vld [vmem:[#allocation2 + $0x368] sm:$0xff]  ;;  %v228_v31 = vld [vmem:[#allocation2 + $0x378] sm:$0xff]  ;;  %v1160_v33 = vpack.c.bf16 %v219_v27, %v215_v26  ;;  %v221_v34 = vld [vmem:[#allocation2 + $0x340] sm:$0xff] }
  0x4c   :  { %1017 = vmatpush1.bf16.msra.mxu0 %v1016_v48  ;;  %v225_v35 = vld [vmem:[#allocation2 + $0x360] sm:$0xff]  ;;  %v1034_v36 = vpack.c.bf16 %v226_v29, %v222_v28  ;;  %v1162_v37 = vpack.c.bf16 %v228_v31, %v224_v30  ;;  %v223_v38 = vld [vmem:[#allocation2 + $0x350] sm:$0xff]  ;;  %v230_v40 = vld [vmem:[#allocation2 + $0x388] sm:$0xff] }
  0x4d   :  { %1145 = vmatpush1.bf16.msra.mxu1 %v1144_v49  ;;  %1019 = vmatprep.subr.bf16.mxu0 %v1018_v52  ;;  %v227_v39 = vld [vmem:[#allocation2 + $0x370] sm:$0xff]  ;;  %v234_v41 = vld [vmem:[#allocation2 + $0x3a8] sm:$0xff]  ;;  %v232_v42 = vld [vmem:[#allocation2 + $0x398] sm:$0xff]  ;;  %v1036_v44 = vpack.c.bf16 %v225_v35, %v221_v34 }
  0x4e   :  { %1147 = vmatprep.subr.bf16.mxu1 %v1146_v53  ;;  %v236_v43 = vld [vmem:[#allocation2 + $0x3b8] sm:$0xff]  ;;  %v1164_v45 = vpack.c.bf16 %v227_v39, %v223_v38  ;;  %v229_v46 = vld [vmem:[#allocation2 + $0x380] sm:$0xff]  ;;  %v1038_v48 = vpack.c.bf16 %v234_v41, %v230_v40  ;;  %v231_v50 = vld [vmem:[#allocation2 + $0x390] sm:$0xff] }
  0x4f   :  { %v233_v47 = vld [vmem:[#allocation2 + $0x3a0] sm:$0xff]  ;;  %v1166_v49 = vpack.c.bf16 %v236_v43, %v232_v42  ;;  %v235_v51 = vld [vmem:[#allocation2 + $0x3b0] sm:$0xff]  ;;  %v238_v52 = vld [vmem:[#allocation2 + $0x3c8] sm:$0xff] }
  0x50   :  { %1021 = vmatpush1.bf16.msra.mxu0 %v1020_v60  ;;  %v242_v53 = vld [vmem:[#allocation2 + $0x3e8] sm:$0xff]  ;;  %v240_v54 = vld [vmem:[#allocation2 + $0x3d8] sm:$0xff]  ;;  %v1040_v56 = vpack.c.bf16 %v233_v47, %v229_v46  ;;  %v1168_v57 = vpack.c.bf16 %v235_v51, %v231_v50  ;;  %v237_v58 = vld [vmem:[#allocation2 + $0x3c0] sm:$0xff] }
  0x51   :  { %1149 = vmatpush1.bf16.msra.mxu1 %v1148_v61  ;;  %1023 = vmatprep.subr.bf16.mxu0 %v1022_v0  ;;  %v244_v55 = vld [vmem:[#allocation2 + $0x3f8] sm:$0xff]  ;;  %v241_v59 = vld [vmem:[#allocation2 + $0x3e0] sm:$0xff]  ;;  %v1042_v60 = vpack.c.bf16 %v242_v53, %v238_v52  ;;  %v239_v62 = vld [vmem:[#allocation2 + $0x3d0] sm:$0xff] }
  0x52   :  { %1151 = vmatprep.subr.bf16.mxu1 %v1150_v1  ;;  %v1170_v61 = vpack.c.bf16 %v244_v55, %v240_v54  ;;  %v243_v63 = vld [vmem:[#allocation2 + $0x3f0] sm:$0xff]  ;;  %v246_v0 = vld [vmem:[#allocation2 + $0x408] sm:$0xff]  ;;  %v248_v2 = vld [vmem:[#allocation2 + $0x418] sm:$0xff]  ;;  %v1044_v4 = vpack.c.bf16 %v241_v59, %v237_v58 }
  0x53   :  { %v250_v1 = vld [vmem:[#allocation2 + $0x428] sm:$0xff]  ;;  %v252_v3 = vld [vmem:[#allocation2 + $0x438] sm:$0xff]  ;;  %v1172_v5 = vpack.c.bf16 %v243_v63, %v239_v62  ;;  %v56_v14 = vld [vmem:[%s1514_s1] sm:$0xf] }
  0x54   :  { %1025 = vmatpush1.bf16.msra.mxu0 %v1024_v8  ;;  %v1046_v6 = vpack.c.bf16 %v250_v1, %v246_v0  ;;  %v1174_v7 = vpack.c.bf16 %v252_v3, %v248_v2  ;;  %v63_v8 = vlaneseq  ;;  %v87_v15 = vld [vmem:[%s1515_s2] sm:$0xf]  ;;  %v245_v29 = vld [vmem:[#allocation2 + $0x400] sm:$0xff]  ;;  %v258_v38 = vld [vmem:[#allocation2 + $0x468] sm:$0xff] }
  0x55   :  { %1153 = vmatpush1.bf16.msra.mxu1 %v1152_v9  ;;  %1027 = vmatprep.subr.bf16.mxu0 %v1026_v12  ;;  %v249_v30 = vld [vmem:[#allocation2 + $0x420] sm:$0xff]  ;;  %v247_v31 = vld [vmem:[#allocation2 + $0x410] sm:$0xff]  ;;  %v256_v39 = vld [vmem:[#allocation2 + $0x458] sm:$0xff] }
  0x56   :  { %1155 = vmatprep.subr.bf16.mxu1 %v1154_v13  ;;  %v64_v9 = vshrl.u32 %v63_v8, 7  ;;  %v260_v40 = vld [vmem:[#allocation2 + $0x478] sm:$0xff]  ;;  %v1048_v43 = vpack.c.bf16 %v249_v30, %v245_v29  ;;  %v257_v46 = vld [vmem:[#allocation2 + $0x460] sm:$0xff]  ;;  %v255_v47 = vld [vmem:[#allocation2 + $0x450] sm:$0xff] }
  0x57   :  { %v1178_v51 = vpack.c.bf16 %v260_v40, %v256_v39  ;;  %v266_v52 = vld [vmem:[#allocation2 + $0x4a8] sm:$0xff]  ;;  %v264_v53 = vld [vmem:[#allocation2 + $0x498] sm:$0xff]  ;;  %v261_v58 = vld [vmem:[#allocation2 + $0x480] sm:$0xff] }
  0x58   :  { %1029 = vmatpush1.bf16.msra.mxu0 %v1028_v20  ;;  %v1466_v10 = vsub.s32 0, %v64_v9  ;;  %v1468_v11 = vsub.s32 1, %v64_v9  ;;  %v1470_v12 = vsub.s32 2, %v64_v9  ;;  %v1472_v13 = vsub.s32 3, %v64_v9  ;;  %v268_v54 = vld [vmem:[#allocation2 + $0x4b8] sm:$0xff]  ;;  %v265_v59 = vld [vmem:[#allocation2 + $0x4a0] sm:$0xff] }
  0x59   :  { %1157 = vmatpush1.bf16.msra.mxu1 %v1156_v21  ;;  %1031 = vmatprep.subr.bf16.mxu0 %v1030_v24  ;;  %v263_v62 = vld [vmem:[#allocation2 + $0x490] sm:$0xff]  ;;  %v270_v0 = vld [vmem:[#allocation2 + $0x4c8] sm:$0xff]  ;;  %v272_v2 = vld [vmem:[#allocation2 + $0x4d8] sm:$0xff] }
  0x5a   :  { %1159 = vmatprep.subr.bf16.mxu1 %v1158_v25  ;;  %v66_v16 = vrot.slane %v56_v14, %v1466_v10  ;;  %v70_v17 = vrot.slane %v56_v14, %v1468_v11  ;;  %v74_v18 = vrot.slane %v56_v14, %v1470_v12  ;;  %v78_v19 = vrot.slane %v56_v14, %v1472_v13  ;;  %v267_v63 = vld [vmem:[#allocation2 + $0x4b0] sm:$0xff]  ;;  %v274_v1 = vld [vmem:[#allocation2 + $0x4e8] sm:$0xff]  ;;  %v276_v3 = vld [vmem:[#allocation2 + $0x4f8] sm:$0xff] }
  0x5b   :  { %v100_v20 = vrot.slane %v87_v15, %v1470_v12  ;;  %v96_v21 = vrot.slane %v87_v15, %v1468_v11  ;;  %v92_v22 = vrot.slane %v87_v15, %v1466_v10  ;;  %v104_v24 = vrot.slane %v87_v15, %v1472_v13  ;;  %v271_v14 = vld [vmem:[#allocation2 + $0x4d0] sm:$0xff]  ;;  %v290_v29 = vld [vmem:[#allocation2 + $0x568] sm:$0xff]  ;;  %v288_v30 = vld [vmem:[#allocation2 + $0x558] sm:$0xff] }
  0x5c   :  { %1033 = vmatpush1.bf16.msra.mxu0 %v1032_v32  ;;  %v251_v32 = vld [vmem:[#allocation2 + $0x430] sm:$0xff]  ;;  %v1058_v8 = vpack.c.bf16 %v274_v1, %v270_v0  ;;  %v1186_v9 = vpack.c.bf16 %v276_v3, %v272_v2  ;;  %v310_v1 = vld [vmem:[#allocation2 + $0x608] sm:$0xff]  ;;  %v312_v3 = vld [vmem:[#allocation2 + $0x618] sm:$0xff] }
  0x5d   :  { %1161 = vmatpush1.bf16.msra.mxu1 %v1160_v33  ;;  %1035 = vmatprep.subr.bf16.mxu0 %v1034_v36  ;;  %v254_v36 = vld [vmem:[#allocation2 + $0x448] sm:$0xff]  ;;  %v275_v15 = vld [vmem:[#allocation2 + $0x4f0] sm:$0xff] }
  0x5e   :  { %1163 = vmatprep.subr.bf16.mxu1 %v1162_v37  ;;  %v1050_v50 = vpack.c.bf16 %v258_v38, %v254_v36  ;;  %v289_v36 = vld [vmem:[#allocation2 + $0x560] sm:$0xff]  ;;  %v287_v39 = vld [vmem:[#allocation2 + $0x550] sm:$0xff]  ;;  %v314_v2 = vld [vmem:[#allocation2 + $0x628] sm:$0xff] }
  0x5f   :  { %v291_v40 = vld [vmem:[#allocation2 + $0x570] sm:$0xff] }
  0x60   :  { %1037 = vmatpush1.bf16.msra.mxu0 %v1036_v44  ;;  %v1176_v44 = vpack.c.bf16 %v251_v32, %v247_v31  ;;  %v292_v31 = vld [vmem:[#allocation2 + $0x578] sm:$0xff]  ;;  %v307_v0 = vld [vmem:[#allocation2 + $0x5f0] sm:$0xff] }
  0x61   :  { %1165 = vmatpush1.bf16.msra.mxu1 %v1164_v45  ;;  %1039 = vmatprep.subr.bf16.mxu0 %v1038_v48  ;;  %v253_v45 = vld [vmem:[#allocation2 + $0x440] sm:$0xff]  ;;  %v259_v48 = vld [vmem:[#allocation2 + $0x470] sm:$0xff]  ;;  %v1194_v38 = vpack.c.bf16 %v292_v31, %v288_v30  ;;  %v330_v30 = vld [vmem:[#allocation2 + $0x6a8] sm:$0xff] }
  0x62   :  { %1167 = vmatprep.subr.bf16.mxu1 %v1166_v49  ;;  %v262_v49 = vld [vmem:[#allocation2 + $0x488] sm:$0xff]  ;;  %v328_v31 = vld [vmem:[#allocation2 + $0x698] sm:$0xff] }
  0x64   :  { %1041 = vmatpush1.bf16.msra.mxu0 %v1040_v56  ;;  %v1052_v56 = vpack.c.bf16 %v257_v46, %v253_v45  ;;  %v1196_v46 = vpack.c.bf16 %v291_v40, %v287_v39  ;;  %v327_v40 = vld [vmem:[#allocation2 + $0x690] sm:$0xff] }
  0x65   :  { %1169 = vmatpush1.bf16.msra.mxu1 %v1168_v57  ;;  %1043 = vmatprep.subr.bf16.mxu0 %v1042_v60  ;;  %v1180_v57 = vpack.c.bf16 %v259_v48, %v255_v47  ;;  %v1054_v60 = vpack.c.bf16 %v266_v52, %v262_v49  ;;  %v293_v47 = vld [vmem:[#allocation2 + $0x580] sm:$0xff]  ;;  %v299_v52 = vld [vmem:[#allocation2 + $0x5b0] sm:$0xff] }
  0x66   :  { %1171 = vmatprep.subr.bf16.mxu1 %v1170_v61  ;;  %v1182_v61 = vpack.c.bf16 %v268_v54, %v264_v53  ;;  %v297_v48 = vld [vmem:[#allocation2 + $0x5a0] sm:$0xff]  ;;  %v302_v53 = vld [vmem:[#allocation2 + $0x5c8] sm:$0xff] }
  0x67   :  { %v306_v54 = vld [vmem:[#allocation2 + $0x5e8] sm:$0xff] }
  0x68   :  { %1045 = vmatpush1.bf16.msra.mxu0 %v1044_v4  ;;  %v1056_v4 = vpack.c.bf16 %v265_v59, %v261_v58  ;;  %v301_v59 = vld [vmem:[#allocation2 + $0x5c0] sm:$0xff] }
  0x69   :  { %1173 = vmatpush1.bf16.msra.mxu1 %v1172_v5  ;;  %1047 = vmatprep.subr.bf16.mxu0 %v1046_v6  ;;  %v1184_v5 = vpack.c.bf16 %v267_v63, %v263_v62  ;;  %v269_v6 = vld [vmem:[#allocation2 + $0x4c0] sm:$0xff]  ;;  %v303_v63 = vld [vmem:[#allocation2 + $0x5d0] sm:$0xff] }
  0x6a   :  { %1175 = vmatprep.subr.bf16.mxu1 %v1174_v7  ;;  %v273_v7 = vld [vmem:[#allocation2 + $0x4e0] sm:$0xff] }
  0xa8   :  { %v60_v23 = vpop.permute.xlu0 %59 }
  0xa9   :  { %v83_v25 = vmul.f32 %v66_v16, %v60_v23  ;;  %v84_v26 = vmul.f32 %v70_v17, %v60_v23  ;;  %v85_v27 = vmul.f32 %v74_v18, %v60_v23  ;;  %v86_v28 = vmul.f32 %v78_v19, %v60_v23  ;;  %v278_v16 = vld [vmem:[#allocation2 + $0x508] sm:$0xff]  ;;  %v280_v18 = vld [vmem:[#allocation2 + $0x518] sm:$0xff]  ;;  %v281_v23 = vld [vmem:[#allocation2 + $0x520] sm:$0xff] }
  0xaa   :  { %v282_v17 = vld [vmem:[#allocation2 + $0x528] sm:$0xff]  ;;  %v284_v19 = vld [vmem:[#allocation2 + $0x538] sm:$0xff] }
  0xab   :  { %v1488_v33 = vadd.f32 %v100_v20, %v85_v27  ;;  %v110_v34 = vadd.f32 %v96_v21, %v84_v26  ;;  %v109_v35 = vadd.f32 %v92_v22, %v83_v25  ;;  %v112_v37 = vadd.f32 %v104_v24, %v86_v28  ;;  %v277_v22 = vld [vmem:[#allocation2 + $0x500] sm:$0xff]  ;;  %v279_v26 = vld [vmem:[#allocation2 + $0x510] sm:$0xff]  ;;  %v286_v28 = vld [vmem:[#allocation2 + $0x548] sm:$0xff] }
  0xac   :  { %v1060_v20 = vpack.c.bf16 %v273_v7, %v269_v6  ;;  %v1188_v21 = vpack.c.bf16 %v275_v15, %v271_v14  ;;  %v1062_v24 = vpack.c.bf16 %v282_v17, %v278_v16  ;;  %v1190_v25 = vpack.c.bf16 %v284_v19, %v280_v18  ;;  %v283_v27 = vld [vmem:[#allocation2 + $0x530] sm:$0xff]  ;;  %v309_v7 = vld [vmem:[#allocation2 + $0x600] sm:$0xff]  ;;  %v318_v17 = vld [vmem:[#allocation2 + $0x648] sm:$0xff] }
  0xad   :  { %v114_v41 = vmax.f32 %v110_v34, 0.0  ;;  %v113_v42 = vmax.f32 %v109_v35, 0.0  ;;  %v116_v55 = vmax.f32 %v112_v37, 0.0  ;;  %v1064_v32 = vpack.c.bf16 %v281_v23, %v277_v22  ;;  %v285_v35 = vld [vmem:[#allocation2 + $0x540] sm:$0xff]  ;;  %v311_v15 = vld [vmem:[#allocation2 + $0x610] sm:$0xff]  ;;  %v322_v18 = vld [vmem:[#allocation2 + $0x668] sm:$0xff] }
  0xae   :  { %v1192_v34 = vpack.c.bf16 %v283_v27, %v279_v26  ;;  %v1066_v37 = vpack.c.bf16 %v290_v29, %v286_v28  ;;  %v1068_v45 = vpack.c.bf16 %v289_v36, %v285_v35  ;;  %v1204_v6 = vpack.c.bf16 %v307_v0, %v303_v63  ;;  %v315_v16 = vld [vmem:[#allocation2 + $0x630] sm:$0xff]  ;;  %v320_v19 = vld [vmem:[#allocation2 + $0x658] sm:$0xff]  ;;  %v317_v23 = vld [vmem:[#allocation2 + $0x640] sm:$0xff] }
  0xaf   :  { %459 = vmatprep.mubr.f32.mxu0 %v114_v41  ;;  %601 = vmatprep.mubr.f32.mxu1 %v114_v41  ;;  %v294_v41 = vld [vmem:[#allocation2 + $0x588] sm:$0xff]  ;;  %v1208_v22 = vpack.c.bf16 %v315_v16, %v311_v15  ;;  %v319_v27 = vld [vmem:[#allocation2 + $0x650] sm:$0xff]  ;;  %v325_v36 = vld [vmem:[#allocation2 + $0x680] sm:$0xff] }
  0xb0   :  { %460 = vmatmul.mubr.f32.vlgmr.msra.gmra.mrb[0].mxu0 %v113_v42  ;;  %602 = vmatmul.mubr.f32.vlgmr.msra.gmra.mrb[0].mxu1 %v113_v42  ;;  %v298_v42 = vld [vmem:[#allocation2 + $0x5a8] sm:$0xff]  ;;  %v323_v28 = vld [vmem:[#allocation2 + $0x670] sm:$0xff] }
  0xb1   :  { %1049 = vmatpush1.bf16.msra.mxu0 %v1048_v43  ;;  %1177 = vmatpush1.bf16.msra.mxu1 %v1176_v44  ;;  %v296_v43 = vld [vmem:[#allocation2 + $0x598] sm:$0xff]  ;;  %v1070_v49 = vpack.c.bf16 %v298_v42, %v294_v41  ;;  %v326_v29 = vld [vmem:[#allocation2 + $0x688] sm:$0xff]  ;;  %v1212_v35 = vpack.c.bf16 %v323_v28, %v319_v27  ;;  %v331_v41 = vld [vmem:[#allocation2 + $0x6b0] sm:$0xff] }
  0xb2   :  { %530 = vmatprep.mubr.f32.mxu0 %v116_v55  ;;  %672 = vmatprep.mubr.f32.mxu1 %v116_v55  ;;  %v300_v44 = vld [vmem:[#allocation2 + $0x5b8] sm:$0xff]  ;;  %v334_v42 = vld [vmem:[#allocation2 + $0x6c8] sm:$0xff]  ;;  %v343_v0 = vld [vmem:[#allocation2 + $0x710] sm:$0xff] }
  0xb3   :  { %1051 = vmatprep.subr.bf16.mxu0 %v1050_v50  ;;  %1179 = vmatprep.subr.bf16.mxu1 %v1178_v51  ;;  %v1198_v50 = vpack.c.bf16 %v300_v44, %v296_v43  ;;  %v295_v51 = vld [vmem:[#allocation2 + $0x590] sm:$0xff]  ;;  %v304_v55 = vld [vmem:[#allocation2 + $0x5d8] sm:$0xff]  ;;  %v338_v43 = vld [vmem:[#allocation2 + $0x6e8] sm:$0xff] }
  0xb4   :  { %v1200_v58 = vpack.c.bf16 %v299_v52, %v295_v51  ;;  %v336_v44 = vld [vmem:[#allocation2 + $0x6d8] sm:$0xff]  ;;  %v335_v52 = vld [vmem:[#allocation2 + $0x6d0] sm:$0xff] }
  0xb5   :  { %1053 = vmatpush1.bf16.msra.mxu0 %v1052_v56  ;;  %1181 = vmatpush1.bf16.msra.mxu1 %v1180_v57  ;;  %v308_v56 = vld [vmem:[#allocation2 + $0x5f8] sm:$0xff]  ;;  %v1072_v57 = vpack.c.bf16 %v297_v48, %v293_v47  ;;  %v1216_v47 = vpack.c.bf16 %v331_v41, %v327_v40  ;;  %v333_v48 = vld [vmem:[#allocation2 + $0x6c0] sm:$0xff]  ;;  %v351_v16 = vld [vmem:[#allocation2 + $0x750] sm:$0xff] }
  0xb6   :  { %1055 = vmatprep.subr.bf16.mxu0 %v1054_v60  ;;  %1183 = vmatprep.subr.bf16.mxu1 %v1182_v61  ;;  %v305_v60 = vld [vmem:[#allocation2 + $0x5e0] sm:$0xff]  ;;  %v1074_v61 = vpack.c.bf16 %v306_v54, %v302_v53  ;;  %v1202_v62 = vpack.c.bf16 %v308_v56, %v304_v55  ;;  %v339_v53 = vld [vmem:[#allocation2 + $0x6f0] sm:$0xff]  ;;  %v342_v54 = vld [vmem:[#allocation2 + $0x708] sm:$0xff] }
  0xb7   :  { %v346_v55 = vld [vmem:[#allocation2 + $0x728] sm:$0xff]  ;;  %v344_v56 = vld [vmem:[#allocation2 + $0x718] sm:$0xff]  ;;  %v359_v28 = vld [vmem:[#allocation2 + $0x790] sm:$0xff] }
  0xb8   :  { %v367_v41 = vld [vmem:[#allocation2 + $0x7d0] sm:$0xff] }
  0xb9   :  { %1057 = vmatpush1.bf16.msra.mxu0 %v1056_v4  ;;  %1185 = vmatpush1.bf16.msra.mxu1 %v1184_v5  ;;  %v316_v4 = vld [vmem:[#allocation2 + $0x638] sm:$0xff]  ;;  %v1076_v5 = vpack.c.bf16 %v305_v60, %v301_v59  ;;  %v1220_v59 = vpack.c.bf16 %v339_v53, %v335_v52  ;;  %v341_v60 = vld [vmem:[#allocation2 + $0x700] sm:$0xff] }
  0xba   :  { %1059 = vmatprep.subr.bf16.mxu0 %v1058_v8  ;;  %1187 = vmatprep.subr.bf16.mxu1 %v1186_v9  ;;  %v313_v8 = vld [vmem:[#allocation2 + $0x620] sm:$0xff]  ;;  %v1078_v9 = vpack.c.bf16 %v314_v2, %v310_v1  ;;  %v1206_v14 = vpack.c.bf16 %v316_v4, %v312_v3  ;;  %v347_v1 = vld [vmem:[#allocation2 + $0x730] sm:$0xff]  ;;  %v350_v2 = vld [vmem:[#allocation2 + $0x748] sm:$0xff] }
  0xbb   :  { %v354_v3 = vld [vmem:[#allocation2 + $0x768] sm:$0xff]  ;;  %v352_v4 = vld [vmem:[#allocation2 + $0x758] sm:$0xff]  ;;  %v715_v53 = vld [vmem:[#allocation5 + $0x100] sm:$0xff] }
  0xbd   :  { %1061 = vmatpush1.bf16.msra.mxu0 %v1060_v20  ;;  %1189 = vmatpush1.bf16.msra.mxu1 %v1188_v21  ;;  %v324_v20 = vld [vmem:[#allocation2 + $0x678] sm:$0xff]  ;;  %v1080_v21 = vpack.c.bf16 %v313_v8, %v309_v7  ;;  %v1224_v7 = vpack.c.bf16 %v347_v1, %v343_v0  ;;  %v349_v8 = vld [vmem:[#allocation2 + $0x740] sm:$0xff] }
  0xbe   :  { %1063 = vmatprep.subr.bf16.mxu0 %v1062_v24  ;;  %1191 = vmatprep.subr.bf16.mxu1 %v1190_v25  ;;  %v321_v24 = vld [vmem:[#allocation2 + $0x660] sm:$0xff]  ;;  %v1082_v25 = vpack.c.bf16 %v322_v18, %v318_v17  ;;  %v1210_v26 = vpack.c.bf16 %v324_v20, %v320_v19  ;;  %v355_v17 = vld [vmem:[#allocation2 + $0x770] sm:$0xff]  ;;  %v358_v18 = vld [vmem:[#allocation2 + $0x788] sm:$0xff] }
  0xbf   :  { %v362_v19 = vld [vmem:[#allocation2 + $0x7a8] sm:$0xff]  ;;  %v360_v20 = vld [vmem:[#allocation2 + $0x798] sm:$0xff] }
  0xc1   :  { %1065 = vmatpush1.bf16.msra.mxu0 %v1064_v32  ;;  %1193 = vmatpush1.bf16.msra.mxu1 %v1192_v34  ;;  %v332_v32 = vld [vmem:[#allocation2 + $0x6b8] sm:$0xff]  ;;  %v1084_v34 = vpack.c.bf16 %v321_v24, %v317_v23  ;;  %v1228_v23 = vpack.c.bf16 %v355_v17, %v351_v16  ;;  %v357_v24 = vld [vmem:[#allocation2 + $0x780] sm:$0xff] }
  0xc2   :  { %1067 = vmatprep.subr.bf16.mxu0 %v1066_v37  ;;  %1195 = vmatprep.subr.bf16.mxu1 %v1194_v38  ;;  %v329_v37 = vld [vmem:[#allocation2 + $0x6a0] sm:$0xff]  ;;  %v1086_v38 = vpack.c.bf16 %v330_v30, %v326_v29  ;;  %v1214_v39 = vpack.c.bf16 %v332_v32, %v328_v31  ;;  %v363_v29 = vld [vmem:[#allocation2 + $0x7b0] sm:$0xff]  ;;  %v366_v30 = vld [vmem:[#allocation2 + $0x7c8] sm:$0xff] }
  0xc3   :  { %v370_v31 = vld [vmem:[#allocation2 + $0x7e8] sm:$0xff]  ;;  %v368_v32 = vld [vmem:[#allocation2 + $0x7d8] sm:$0xff]  ;;  %v719_v17 = vld [vmem:[#allocation5 + $0x120] sm:$0xff] }
  0xc5   :  { %1069 = vmatpush1.bf16.msra.mxu0 %v1068_v45  ;;  %1197 = vmatpush1.bf16.msra.mxu1 %v1196_v46  ;;  %v340_v45 = vld [vmem:[#allocation2 + $0x6f8] sm:$0xff]  ;;  %v1088_v46 = vpack.c.bf16 %v329_v37, %v325_v36  ;;  %v1232_v36 = vpack.c.bf16 %v363_v29, %v359_v28  ;;  %v365_v37 = vld [vmem:[#allocation2 + $0x7c0] sm:$0xff]  ;;  %v721_v29 = vld [vmem:[#allocation5 + $0x130] sm:$0xff] }
  0xc6   :  { %1071 = vmatprep.subr.bf16.mxu0 %v1070_v49  ;;  %1199 = vmatprep.subr.bf16.mxu1 %v1198_v50  ;;  %v337_v49 = vld [vmem:[#allocation2 + $0x6e0] sm:$0xff]  ;;  %v1090_v50 = vpack.c.bf16 %v338_v43, %v334_v42  ;;  %v1218_v51 = vpack.c.bf16 %v340_v45, %v336_v44  ;;  %v371_v42 = vld [vmem:[#allocation2 + $0x7f0] sm:$0xff]  ;;  %v700_v44 = vld [vmem:[#allocation5 + $0x88] sm:$0xff] }
  0xc7   :  { %v699_v43 = vld [vmem:[#allocation5 + $0x80] sm:$0xff] }
  0xc8   :  { %v731_v45 = vld [vmem:[#allocation5 + $0x180] sm:$0xff] }
  0xc9   :  { %1073 = vmatpush1.bf16.msra.mxu0 %v1072_v57  ;;  %1201 = vmatpush1.bf16.msra.mxu1 %v1200_v58  ;;  %v348_v57 = vld [vmem:[#allocation2 + $0x738] sm:$0xff]  ;;  %v1092_v58 = vpack.c.bf16 %v337_v49, %v333_v48  ;;  %v1236_v48 = vpack.c.bf16 %v371_v42, %v367_v41  ;;  %v683_v49 = vld [vmem:[#allocation5] sm:$0xff] }
  0xca   :  { %1075 = vmatprep.subr.bf16.mxu0 %v1074_v61  ;;  %1203 = vmatprep.subr.bf16.mxu1 %v1202_v62  ;;  %v345_v61 = vld [vmem:[#allocation2 + $0x720] sm:$0xff]  ;;  %v1094_v62 = vpack.c.bf16 %v346_v55, %v342_v54  ;;  %v1222_v63 = vpack.c.bf16 %v348_v57, %v344_v56  ;;  %v716_v54 = vld [vmem:[#allocation5 + $0x108] sm:$0xff]  ;;  %v701_v55 = vld [vmem:[#allocation5 + $0x90] sm:$0xff] }
  0xcb   :  { %v702_v56 = vld [vmem:[#allocation5 + $0x98] sm:$0xff]  ;;  %v733_v57 = vld [vmem:[#allocation5 + $0x190] sm:$0xff]  ;;  %v723_v42 = vld [vmem:[#allocation5 + $0x140] sm:$0xff] }
  0xcc   :  { %v1242_v0 = vpack.c.bf16 %v702_v56, %v701_v55  ;;  %v726_v55 = vld [vmem:[#allocation5 + $0x158] sm:$0xff]  ;;  %v711_v56 = vld [vmem:[#allocation5 + $0xe0] sm:$0xff] }
  0xcd   :  { %1077 = vmatpush1.bf16.msra.mxu0 %v1076_v5  ;;  %1205 = vmatpush1.bf16.msra.mxu1 %v1204_v6  ;;  %v356_v5 = vld [vmem:[#allocation2 + $0x778] sm:$0xff]  ;;  %v1096_v6 = vpack.c.bf16 %v345_v61, %v341_v60  ;;  %v1272_v60 = vpack.c.bf16 %v716_v54, %v715_v53  ;;  %v685_v61 = vld [vmem:[#allocation5 + $0x10] sm:$0xff] }
  0xce   :  { %1079 = vmatprep.subr.bf16.mxu0 %v1078_v9  ;;  %1207 = vmatprep.subr.bf16.mxu1 %v1206_v14  ;;  %v353_v9 = vld [vmem:[#allocation2 + $0x760] sm:$0xff]  ;;  %v1098_v14 = vpack.c.bf16 %v354_v3, %v350_v2  ;;  %v1226_v15 = vpack.c.bf16 %v356_v5, %v352_v4  ;;  %v717_v2 = vld [vmem:[#allocation5 + $0x110] sm:$0xff]  ;;  %v718_v3 = vld [vmem:[#allocation5 + $0x118] sm:$0xff] }
  0xcf   :  { %v703_v4 = vld [vmem:[#allocation5 + $0xa0] sm:$0xff]  ;;  %v704_v5 = vld [vmem:[#allocation5 + $0xa8] sm:$0xff]  ;;  %v725_v54 = vld [vmem:[#allocation5 + $0x150] sm:$0xff] }
  0xd1   :  { %1081 = vmatpush1.bf16.msra.mxu0 %v1080_v21  ;;  %1209 = vmatpush1.bf16.msra.mxu1 %v1208_v22  ;;  %v364_v21 = vld [vmem:[#allocation2 + $0x7b8] sm:$0xff]  ;;  %v1100_v22 = vpack.c.bf16 %v353_v9, %v349_v8  ;;  %v1276_v9 = vpack.c.bf16 %v718_v3, %v717_v2  ;;  %v727_v2 = vld [vmem:[#allocation5 + $0x160] sm:$0xff] }
  0xd2   :  { %1083 = vmatprep.subr.bf16.mxu0 %v1082_v25  ;;  %1211 = vmatprep.subr.bf16.mxu1 %v1210_v26  ;;  %v361_v25 = vld [vmem:[#allocation2 + $0x7a0] sm:$0xff]  ;;  %v1102_v26 = vpack.c.bf16 %v362_v19, %v358_v18  ;;  %v1230_v27 = vpack.c.bf16 %v364_v21, %v360_v20  ;;  %v720_v18 = vld [vmem:[#allocation5 + $0x128] sm:$0xff]  ;;  %v705_v19 = vld [vmem:[#allocation5 + $0xb0] sm:$0xff] }
  0xd3   :  { %v706_v20 = vld [vmem:[#allocation5 + $0xb8] sm:$0xff]  ;;  %v737_v21 = vld [vmem:[#allocation5 + $0x1b0] sm:$0xff] }
  0xd5   :  { %1085 = vmatpush1.bf16.msra.mxu0 %v1084_v34  ;;  %1213 = vmatpush1.bf16.msra.mxu1 %v1212_v35  ;;  %v372_v34 = vld [vmem:[#allocation2 + $0x7f8] sm:$0xff]  ;;  %v1104_v35 = vpack.c.bf16 %v361_v25, %v357_v24  ;;  %v1280_v24 = vpack.c.bf16 %v720_v18, %v719_v17  ;;  %v689_v25 = vld [vmem:[#allocation5 + $0x30] sm:$0xff] }
  0xd6   :  { %1087 = vmatprep.subr.bf16.mxu0 %v1086_v38  ;;  %1215 = vmatprep.subr.bf16.mxu1 %v1214_v39  ;;  %v369_v38 = vld [vmem:[#allocation2 + $0x7e0] sm:$0xff]  ;;  %v1106_v39 = vpack.c.bf16 %v370_v31, %v366_v30  ;;  %v1234_v40 = vpack.c.bf16 %v372_v34, %v368_v32  ;;  %v722_v30 = vld [vmem:[#allocation5 + $0x138] sm:$0xff]  ;;  %v708_v32 = vld [vmem:[#allocation5 + $0xc8] sm:$0xff] }
  0xd7   :  { %v707_v31 = vld [vmem:[#allocation5 + $0xc0] sm:$0xff]  ;;  %v729_v18 = vld [vmem:[#allocation5 + $0x170] sm:$0xff] }
  0xd8   :  { %v739_v34 = vld [vmem:[#allocation5 + $0x1c0] sm:$0xff] }
  0xd9   :  { %1089 = vmatpush1.bf16.msra.mxu0 %v1088_v46  ;;  %1217 = vmatpush1.bf16.msra.mxu1 %v1216_v47  ;;  %v732_v46 = vld [vmem:[#allocation5 + $0x188] sm:$0xff]  ;;  %v1108_v47 = vpack.c.bf16 %v369_v38, %v365_v37  ;;  %v1284_v37 = vpack.c.bf16 %v722_v30, %v721_v29  ;;  %v691_v38 = vld [vmem:[#allocation5 + $0x40] sm:$0xff] }
  0xda   :  { %1091 = vmatprep.subr.bf16.mxu0 %v1090_v50  ;;  %1219 = vmatprep.subr.bf16.mxu1 %v1218_v51  ;;  %v684_v50 = vld [vmem:[#allocation5 + $0x8] sm:$0xff]  ;;  %v1238_v51 = vpack.c.bf16 %v700_v44, %v699_v43  ;;  %v1270_v52 = vpack.c.bf16 %v732_v46, %v731_v45  ;;  %v709_v44 = vld [vmem:[#allocation5 + $0xd0] sm:$0xff]  ;;  %v710_v45 = vld [vmem:[#allocation5 + $0xd8] sm:$0xff] }
  0xdb   :  { %v724_v43 = vld [vmem:[#allocation5 + $0x148] sm:$0xff]  ;;  %v741_v46 = vld [vmem:[#allocation5 + $0x1d0] sm:$0xff] }
  0xdd   :  { %1093 = vmatpush1.bf16.msra.mxu0 %v1092_v58  ;;  %1221 = vmatpush1.bf16.msra.mxu1 %v1220_v59  ;;  %v734_v58 = vld [vmem:[#allocation5 + $0x198] sm:$0xff]  ;;  %v1240_v59 = vpack.c.bf16 %v684_v50, %v683_v49  ;;  %v1288_v49 = vpack.c.bf16 %v724_v43, %v723_v42  ;;  %v693_v50 = vld [vmem:[#allocation5 + $0x50] sm:$0xff] }
  0xde   :  { %1095 = vmatprep.subr.bf16.mxu0 %v1094_v62  ;;  %1223 = vmatprep.subr.bf16.mxu1 %v1222_v63  ;;  %v686_v62 = vld [vmem:[#allocation5 + $0x18] sm:$0xff]  ;;  %v115_v63 = vmax.f32 %v1488_v33, 0.0  ;;  %v1274_v1 = vpack.c.bf16 %v734_v58, %v733_v57  ;;  %v1246_v33 = vpack.c.bf16 %v704_v5, %v703_v4  ;;  %v712_v57 = vld [vmem:[#allocation5 + $0xe8] sm:$0xff]  ;;  %v743_v58 = vld [vmem:[#allocation5 + $0x1e0] sm:$0xff] }
  0xdf   :  { %v1244_v8 = vpack.c.bf16 %v686_v62, %v685_v61  ;;  %v1292_v61 = vpack.c.bf16 %v726_v55, %v725_v54  ;;  %v1262_v62 = vpack.c.bf16 %v712_v57, %v711_v56  ;;  %v728_v4 = vld [vmem:[#allocation5 + $0x168] sm:$0xff] }
  0xe0   :  { %v1296_v5 = vpack.c.bf16 %v728_v4, %v727_v2 }
  0xe1   :  { %1097 = vmatpush1.bf16.msra.mxu0 %v1096_v6  ;;  %1225 = vmatpush1.bf16.msra.mxu1 %v1224_v7  ;;  %v735_v6 = vld [vmem:[#allocation5 + $0x1a0] sm:$0xff]  ;;  %v736_v7 = vld [vmem:[#allocation5 + $0x1a8] sm:$0xff] }
  0xe2   :  { %1099 = vmatprep.subr.bf16.mxu0 %v1098_v14  ;;  %1227 = vmatprep.subr.bf16.mxu1 %v1226_v15  ;;  %v687_v14 = vld [vmem:[#allocation5 + $0x20] sm:$0xff]  ;;  %v688_v15 = vld [vmem:[#allocation5 + $0x28] sm:$0xff]  ;;  %v1278_v16 = vpack.c.bf16 %v736_v7, %v735_v6  ;;  %v713_v6 = vld [vmem:[#allocation5 + $0xf0] sm:$0xff] }
  0xe3   :  { %v714_v7 = vld [vmem:[#allocation5 + $0xf8] sm:$0xff] }
  0xe5   :  { %1101 = vmatpush1.bf16.msra.mxu0 %v1100_v22  ;;  %1229 = vmatpush1.bf16.msra.mxu1 %v1228_v23  ;;  %v738_v22 = vld [vmem:[#allocation5 + $0x1b8] sm:$0xff]  ;;  %v1248_v23 = vpack.c.bf16 %v688_v15, %v687_v14  ;;  %v697_v15 = vld [vmem:[#allocation5 + $0x70] sm:$0xff] }
  0xe6   :  { %1103 = vmatprep.subr.bf16.mxu0 %v1102_v26  ;;  %1231 = vmatprep.subr.bf16.mxu1 %v1230_v27  ;;  %v690_v26 = vld [vmem:[#allocation5 + $0x38] sm:$0xff]  ;;  %v1250_v27 = vpack.c.bf16 %v706_v20, %v705_v19  ;;  %v1282_v28 = vpack.c.bf16 %v738_v22, %v737_v21  ;;  %v373_v21 = vld [vmem:[%s1517_s4] sm:$0xf] }
  0xe7   :  { %v746_v14 = vld [vmem:[#allocation5 + $0x1f8] sm:$0xff]  ;;  %v378_v22 = vrot.slane %v373_v21, %v1466_v10 }
  0xe8   :  { %v730_v19 = vld [vmem:[#allocation5 + $0x178] sm:$0xff] }
  0xe9   :  { %1105 = vmatpush1.bf16.msra.mxu0 %v1104_v35  ;;  %1233 = vmatpush1.bf16.msra.mxu1 %v1232_v36  ;;  %v740_v35 = vld [vmem:[#allocation5 + $0x1c8] sm:$0xff]  ;;  %v1252_v36 = vpack.c.bf16 %v690_v26, %v689_v25  ;;  %v1300_v20 = vpack.c.bf16 %v730_v19, %v729_v18  ;;  %v390_v25 = vrot.slane %v373_v21, %v1472_v13 }
  0xea   :  { %1107 = vmatprep.subr.bf16.mxu0 %v1106_v39  ;;  %1235 = vmatprep.subr.bf16.mxu1 %v1234_v40  ;;  %v692_v39 = vld [vmem:[#allocation5 + $0x48] sm:$0xff]  ;;  %v1254_v40 = vpack.c.bf16 %v708_v32, %v707_v31  ;;  %v1286_v41 = vpack.c.bf16 %v740_v35, %v739_v34 }
  0xed   :  { %1109 = vmatpush1.bf16.msra.mxu0 %v1108_v47  ;;  %1237 = vmatpush1.bf16.msra.mxu1 %v1236_v48  ;;  %v742_v47 = vld [vmem:[#allocation5 + $0x1d8] sm:$0xff]  ;;  %v1256_v48 = vpack.c.bf16 %v692_v39, %v691_v38 }
  0xee   :  { %1239 = vmatprep.subr.bf16.mxu0 %v1238_v51  ;;  %1271 = vmatprep.subr.bf16.mxu1 %v1270_v52  ;;  %v694_v51 = vld [vmem:[#allocation5 + $0x58] sm:$0xff]  ;;  %v1258_v52 = vpack.c.bf16 %v710_v45, %v709_v44  ;;  %v1290_v53 = vpack.c.bf16 %v742_v47, %v741_v46 }
  0xf0   :  { %531 = vmatmul.mubr.f32.vlgmr.msra.gmra.mrb[0].mxu0 %v115_v63  ;;  %673 = vmatmul.mubr.f32.vlgmr.msra.gmra.mrb[0].mxu1 %v115_v63 }
  0xf1   :  { %1241 = vmatpush3.bf16.msra.mxu0 %v1240_v59  ;;  %1273 = vmatpush3.bf16.msra.mxu1 %v1272_v60  ;;  %v744_v59 = vld [vmem:[#allocation5 + $0x1e8] sm:$0xff]  ;;  %v1260_v60 = vpack.c.bf16 %v694_v51, %v693_v50 }
  0xf2   :  { %1243 = vmatprep.subr.bf16.mxu0 %v1242_v0  ;;  %1275 = vmatprep.subr.bf16.mxu1 %v1274_v1  ;;  %v1294_v63 = vpack.c.bf16 %v744_v59, %v743_v58  ;;  %v695_v0 = vld [vmem:[#allocation5 + $0x60] sm:$0xff]  ;;  %v696_v1 = vld [vmem:[#allocation5 + $0x68] sm:$0xff] }
  0xf3   :  { %v1264_v3 = vpack.c.bf16 %v696_v1, %v695_v0 }
  0xf5   :  { %1245 = vmatpush3.bf16.msra.mxu0 %v1244_v8  ;;  %1277 = vmatpush3.bf16.msra.mxu1 %v1276_v9  ;;  %v745_v8 = vld [vmem:[#allocation5 + $0x1f0] sm:$0xff]  ;;  %v1266_v9 = vpack.c.bf16 %v714_v7, %v713_v6 }
  0xf6   :  { %1247 = vmatprep.subr.bf16.mxu0 %v1246_v33  ;;  %1279 = vmatprep.subr.bf16.mxu1 %v1278_v16  ;;  %v698_v33 = vld [vmem:[#allocation5 + $0x78] sm:$0xff]  ;;  %v1298_v16 = vpack.c.bf16 %v746_v14, %v745_v8 }
  0xf7   :  { %v1268_v17 = vpack.c.bf16 %v698_v33, %v697_v15 }
  0xf9   :  { %1249 = vmatpush3.bf16.msra.mxu0 %v1248_v23  ;;  %1281 = vmatpush3.bf16.msra.mxu1 %v1280_v24  ;;  %v386_v23 = vrot.slane %v373_v21, %v1470_v12  ;;  %v382_v24 = vrot.slane %v373_v21, %v1468_v11  ;;  %v911_v12 = vld [vmem:[%s1519_s6] ss:$0 sm:$0xff] }
  0xfa   :  { %1251 = vmatprep.subr.bf16.mxu0 %v1250_v27  ;;  %1283 = vmatprep.subr.bf16.mxu1 %v1282_v28 }
  0xfd   :  { %1253 = vmatpush3.bf16.msra.mxu0 %v1252_v36  ;;  %1285 = vmatpush3.bf16.msra.mxu1 %v1284_v37 }
  0xfe   :  { %1255 = vmatprep.subr.bf16.mxu0 %v1254_v40  ;;  %1287 = vmatprep.subr.bf16.mxu1 %v1286_v41 }
 0x101   :  { %1257 = vmatpush3.bf16.msra.mxu0 %v1256_v48  ;;  %1289 = vmatpush3.bf16.msra.mxu1 %v1288_v49 }
 0x102   :  { %1259 = vmatprep.subr.bf16.mxu0 %v1258_v52  ;;  %1291 = vmatprep.subr.bf16.mxu1 %v1290_v53 }
 0x105   :  { %1261 = vmatpush3.bf16.msra.mxu0 %v1260_v60  ;;  %1293 = vmatpush3.bf16.msra.mxu1 %v1292_v61 }
 0x106   :  { %1263 = vmatprep.subr.bf16.mxu0 %v1262_v62  ;;  %1295 = vmatprep.subr.bf16.mxu1 %v1294_v63 }
 0x109   :  { %1265 = vmatpush3.bf16.msra.mxu0 %v1264_v3  ;;  %1297 = vmatpush3.bf16.msra.mxu1 %v1296_v5 }
 0x10a   :  { %1267 = vmatprep.subr.bf16.mxu0 %v1266_v9  ;;  %1299 = vmatprep.subr.bf16.mxu1 %v1298_v16 }
 0x10d   :  { %1269 = vmatpush3.bf16.msra.mxu0 %v1268_v17  ;;  %1301 = vmatpush3.bf16.msra.mxu1 %v1300_v20 }
 0x1c3   :  { %v532_v26 = vpop.f32.mrb[0].mxu0  ;;  %v674_v27 = vpop.f32.mrb[0].mxu1 }
 0x1c4   :  { %v1302_v28 = vadd.f32 %v532_v26, %v378_v22  ;;  %v1304_v29 = vadd.f32 %v674_v27, %v386_v23  ;;  %v534_v30 = vpop.f32.mrb[1].mxu0  ;;  %v676_v31 = vpop.f32.mrb[1].mxu1 }
 0x1c5   :  { %v1303_v32 = vadd.f32 %v534_v30, %v382_v24  ;;  %v1305_v34 = vadd.f32 %v676_v31, %v390_v25 }
 0x1c6   :  { %v679_v37 = vmax.f32 %v1302_v28, 0.0  ;;  %v681_v38 = vmax.f32 %v1304_v29, 0.0 }
 0x1c7   :  { %v680_v35 = vmax.f32 %v1303_v32, 0.0  ;;  %v682_v36 = vmax.f32 %v1305_v34, 0.0 }
 0x1c9   :  { %818 = vmatprep.mubr.f32.mxu0 %v680_v35  ;;  %888 = vmatprep.mubr.f32.mxu1 %v682_v36 }
 0x1ca   :  { %819 = vmatmul.mubr.f32.vlgmr.msra.gmra.mrb[2].mxu0 %v679_v37  ;;  %889 = vmatmul.mubr.f32.vlgmr.msra.gmra.mrb[2].mxu1 %v681_v38 }
 0x29d   :  { %v944_v10 = vpop.f32.mrb[2].mxu0  ;;  %v979_v11 = vpop.f32.mrb[2].mxu1 }
 0x29e   :  { %v945_v13 = vpop.f32.mrb[3].mxu0  ;;  %v980_v39 = vpop.f32.mrb[3].mxu1 }
 0x29f   :  { %v946_v40 = vadd.f32 %v945_v13, %v944_v10  ;;  %v981_v41 = vadd.f32 %v980_v39, %v979_v11 }
 0x2a1   :  { %v821_v42 = vadd.f32 %v946_v40, %v911_v12 }
 0x2a3   :  { %v891_v43 = vadd.f32 %v981_v41, %v821_v42 }
 0x2a5   :  { %894 = vst [vmem:[#allocation7] sm:$0xff] %v891_v43 }
 0x2a6   :  { %1374 = shalt.err (!%p1371_p6)
}
 0x2a7   :  { %s1375_s6 = scalar_lea.hbm %s1520_s7, 128 }
 0x2a8   :  { %p1376_p7 = scmp.ne.s32.totalorder %s1520_s7, %s1375_s6  ;;  %p1379_p8 = scmp.lt.u32.totalorder %s1375_s6, %s1520_s7 }
 0x2aa   :  { %p1381_p9 = pnand %p1379_p8, %p1376_p7 }
 0x2ac   :  { %1384 = shalt.err (!%p1381_p9)
}
 0x2ad   :  { %904 = dma.vmem_to_hbm [thread:$0]  %s902_s11, 128, %s1520_s7, [#allocation4]  }
 0x2ae   :  { %1389 = dma.done.wait [#allocation4], 128  }
 0x2af   :  { %1390 = vsyncadd [#allocation4], 4294967168 }
 0x2b0   :  { %908 = vsyncpa [#allocation3], 1 }
 0x2b1   :  { %909 = vsyncpa [#allocation6], 1 }
 0x2b2   :  { %910 = vsyncpa [#allocation4], 1 }

</bundles_post_ra>
